<compile_context>
chip_gen: v6e
topology: v6e:2x2x1
jax: 0.10.0
libtpu: 0.0.40
codegen_flags: <defaults>
</compile_context>

<pallas_src>
import functools

import jax
import jax.numpy as jnp
from jax import lax
from jax.experimental import pallas as pl
from jax.experimental.pallas import tpu as pltpu


def _lstm_kernel(x_ref, wih_ref, whh_ref, b_ref, h_out_ref, xw_ref):
    """Whole-sequence LSTM in one invocation (everything resident in VMEM).

    x_ref    : (B*T, I)   batch-major flattened input (row b*T + t = (b, t))
    wih_ref  : (I, 4*Hp)  fused, gate-padded input->hidden weights (i|f|g|o),
                          i/f/o columns pre-scaled by 0.5
    whh_ref  : (Hp, 4*Hp) fused, gate-padded hidden->hidden weights (same scale)
    b_ref    : (1, 4*Hp)  fused bias (b_ih + b_hh), gate-padded, same scale
    h_out_ref: (B, H)     final hidden state h_T
    xw_ref   : (B*T, 4*Hp) VMEM scratch holding the hoisted input projection
    """
    B, H = h_out_ref.shape
    Hp = whh_ref.shape[0]
    T = x_ref.shape[0] // B

    w_hh = whh_ref[...]                                   # (Hp, 4Hp), in vregs
    # TODO(synk): holding w_hh in the MXU staging registers across the loop
    # (pltpu.matmul_push_rhs / matmul_acc_lhs / matmul_pop) would remove the
    # per-step RHS push; skipped to stay generation-portable (MRF vs MRB).

    # Hoisted input projection: ONE well-shaped MXU call for all (b, t) rows,
    # bias added once in the prologue (off the serial recurrence path).
    xw_ref[...] = (
        jnp.dot(x_ref[...], wih_ref[...], preferred_element_type=jnp.float32)
        + b_ref[...]
    )                                                      # (B*T, 4Hp)

    # Recurrence with h/c carried in registers (no VMEM round trips for the
    # carry).  T is small & static, so a static unroll keeps the whole chain
    # visible to the LLO scheduler.
    # TODO(synk): if T grows past ~32-48, move to lax.fori_loop(unroll=True)
    # with an (h, c) carry to bound vreg live ranges.
    h = jnp.zeros((B, Hp), jnp.float32)
    c = jnp.zeros((B, Hp), jnp.float32)
    for t in range(T):
        # Strided sublane read gathers the B rows of time step t from the
        # batch-major projection (rows t, t+T, ..., t+(B-1)*T).
        xw_t = xw_ref[pl.ds(t, B, stride=T), :]            # (B, 4Hp)
        gates = xw_t + jnp.dot(h, w_hh, preferred_element_type=jnp.float32)
        # i/f/o columns were pre-scaled by 0.5, so a single full-vreg tanh
        # yields all four activations:
        #   sigmoid(z) = 0.5 * (1 + tanh(z / 2)),   tanh(z) directly for g.
        y = jnp.tanh(gates)                                 # (B, 4Hp), 1 EUP pass
        i_g = 0.5 * (y[:, 0 * Hp:1 * Hp] + 1.0)
        f_g = 0.5 * (y[:, 1 * Hp:2 * Hp] + 1.0)
        g_g = y[:, 2 * Hp:3 * Hp]
        o_g = 0.5 * (y[:, 3 * Hp:4 * Hp] + 1.0)
        c = f_g * c + i_g * g_g
        h = o_g * jnp.tanh(c)

    # Padded hidden lanes of h are exactly 0 every step (zero weights/bias =>
    # gates=0 => i=f=o=0.5, g=0, and c starts at 0), so slicing back to the H
    # real lanes is exact.  Keeping the slice in-kernel avoids an extra XLA
    # slice op in the wrapper (the 24-lane store is a single masked vst).
    h_out_ref[...] = h[:, :H]


def _pad_gate_cols(w, H, Hp):
    """(rows, 4H) with gate blocks [i|f|g|o] of width H -> (rows, 4*Hp), zero-padded."""
    rows = w.shape[0]
    w4 = w.reshape(rows, 4, H)
    w4 = jnp.pad(w4, ((0, 0), (0, 0), (0, Hp - H)))
    return w4.reshape(rows, 4 * Hp)


def prepare_lstm_params(w_ih, w_hh, b_ih, b_hh):
    """One-time relayout + pre-scaling of PyTorch nn.LSTM parameters.

    w_ih : (4H, I)  PyTorch weight_ih_l0 (row blocks ordered i, f, g, o)
    w_hh : (4H, H)  PyTorch weight_hh_l0
    b_ih : (4H,)    PyTorch bias_ih_l0
    b_hh : (4H,)    PyTorch bias_hh_l0
    Returns wih_p:(I,4Hp), whh_p:(Hp,4Hp), b_p:(1,4Hp) with 4*Hp % 128 == 0 and
    the i/f/o gate rows scaled by 0.5 (exact power-of-two scale) so the kernel
    can use a single tanh per step: sigmoid(z) = 0.5*(1 + tanh(z/2)).
    """
    H = w_hh.shape[1]
    Hp = ((H + 31) // 32) * 32                           # 4*Hp multiple of 128
    gate_scale = jnp.concatenate([
        jnp.full((H,), 0.5, jnp.float32),                # i
        jnp.full((H,), 0.5, jnp.float32),                # f
        jnp.ones((H,), jnp.float32),                     # g (plain tanh)
        jnp.full((H,), 0.5, jnp.float32),                # o
    ])                                                   # (4H,)
    w_ih_s = w_ih.astype(jnp.float32) * gate_scale[:, None]   # (4H, I)
    w_hh_s = w_hh.astype(jnp.float32) * gate_scale[:, None]   # (4H, H)
    b_s = (b_ih + b_hh).astype(jnp.float32) * gate_scale      # (4H,)

    wih_p = _pad_gate_cols(w_ih_s.T, H, Hp)                            # (I, 4Hp)
    whh_t = jnp.pad(w_hh_s.T, ((0, Hp - H), (0, 0)))                   # (Hp, 4H)
    whh_p = _pad_gate_cols(whh_t, H, Hp)                               # (Hp, 4Hp)
    b_p = _pad_gate_cols(b_s.reshape(1, 4 * H), H, Hp)                 # (1, 4Hp)
    return wih_p, whh_p, b_p


@functools.partial(jax.jit, static_argnames=("hidden_dim",))
def lstm_block_forward(x, wih_p, whh_p, b_p, *, hidden_dim):
    """Mirrors Lstm_block.forward: returns h_T of shape (batch, hidden_dim).

    x : (B, T, I) batch_first input (same as the PyTorch module).
    wih_p / whh_p / b_p : packed params from prepare_lstm_params (cached once).

    Note: for many independent Lstm_block instances / larger batch, stack rows
    up to ~128-256 into one call to amortize fixed launch + DMA overheads.
    """
    B, T, I = x.shape
    Hp = whh_p.shape[0]
    # Batch-major flatten is a free, contiguous reshape (no transpose op, no
    # extra HBM round trip); the per-time-step gather happens in-kernel.
    x2 = x.reshape(B * T, I).astype(jnp.float32)
    return pl.pallas_call(
        _lstm_kernel,
        out_shape=jax.ShapeDtypeStruct((B, hidden_dim), jnp.float32),
        in_specs=[pl.BlockSpec(memory_space=pltpu.MemorySpace.VMEM)] * 4,
        out_specs=pl.BlockSpec(memory_space=pltpu.MemorySpace.VMEM),
        scratch_shapes=[pltpu.VMEM((B * T, 4 * Hp), jnp.float32)],
    )(x2, wih_p, whh_p, b_p)


def lstm_block_reference(x, w_ih, w_hh, b_ih, b_hh):
    """Pure-JAX reference (lax.scan) with identical PyTorch LSTM semantics."""
    B, T, I = x.shape
    H = w_hh.shape[1]
    x_tm = jnp.transpose(x, (1, 0, 2)).astype(jnp.float32)
    b = (b_ih + b_hh).astype(jnp.float32)

    def step(carry, x_t):
        h, c = carry
        gates = x_t @ w_ih.T + h @ w_hh.T + b            # (B, 4H)
        i = jax.nn.sigmoid(gates[:, 0 * H:1 * H])
        f = jax.nn.sigmoid(gates[:, 1 * H:2 * H])
        g = jnp.tanh(gates[:, 2 * H:3 * H])
        o = jax.nn.sigmoid(gates[:, 3 * H:4 * H])
        c_new = f * c + i * g
        h_new = o * jnp.tanh(c_new)
        return (h_new, c_new), None

    h0 = jnp.zeros((B, H), jnp.float32)
    c0 = jnp.zeros((B, H), jnp.float32)
    (h_T, _), _ = lax.scan(step, (h0, c0), x_tm)
    return h_T


if __name__ == "__main__":
    # Module config: input_dim=16, hidden_dim=0 -> hidden = int(16*1.5) = 24
    input_dim = 16
    hidden_dim = int(input_dim * 1.5)          # 24
    batch = 8
    seq = 8

    key = jax.random.PRNGKey(0)
    kx, k1, k2, k3, k4 = jax.random.split(key, 5)

    # Deterministic parameter init, same distribution PyTorch nn.LSTM uses:
    # uniform(-1/sqrt(H), 1/sqrt(H)).
    bound = 1.0 / (hidden_dim ** 0.5)
    w_ih = jax.random.uniform(k1, (4 * hidden_dim, input_dim), jnp.float32,
                              -bound, bound)
    w_hh = jax.random.uniform(k2, (4 * hidden_dim, hidden_dim), jnp.float32,
                              -bound, bound)
    b_ih = jax.random.uniform(k3, (4 * hidden_dim,), jnp.float32, -bound, bound)
    b_hh = jax.random.uniform(k4, (4 * hidden_dim,), jnp.float32, -bound, bound)

    x = jax.random.normal(kx, (batch, seq, input_dim), jnp.float32)

    # One-time weight relayout + gate pre-scaling (outside the per-call path).
    wih_p, whh_p, b_p = prepare_lstm_params(w_ih, w_hh, b_ih, b_hh)
    wih_p, whh_p, b_p = jax.block_until_ready((wih_p, whh_p, b_p))

    h_kernel = lstm_block_forward(x, wih_p, whh_p, b_p, hidden_dim=hidden_dim)
    jax.block_until_ready(h_kernel)

    h_ref = lstm_block_reference(x, w_ih, w_hh, b_ih, b_hh)
    assert h_kernel.shape == (batch, hidden_dim)
    assert jnp.allclose(h_kernel, h_ref, atol=1e-5, rtol=1e-5), (
        float(jnp.max(jnp.abs(h_kernel - h_ref))))

    print("KERNEL_OK")
</pallas_src>

<mosaic_0001>
module attributes {stable_mosaic.version = 11 : i64} {
  func.func @_lstm_kernel(%arg0: memref<64x16xf32, #tpu.memory_space<vmem>>, %arg1: memref<16x128xf32, #tpu.memory_space<vmem>>, %arg2: memref<32x128xf32, #tpu.memory_space<vmem>>, %arg3: memref<1x128xf32, #tpu.memory_space<vmem>>, %arg4: memref<8x24xf32, #tpu.memory_space<vmem>>, %arg5: memref<64x128xf32, #tpu.memory_space<vmem>>) attributes {dimension_semantics = [], scalar_prefetch = 0 : i64, scratch_operands = 1 : i64, tpu.core_type = #tpu.core_type<tc>} {
    %c0 = arith.constant 0 : index
    %c0_0 = arith.constant 0 : index
    %0 = vector.load %arg2[%c0, %c0_0] : memref<32x128xf32, #tpu.memory_space<vmem>>, vector<32x128xf32>
    %c0_1 = arith.constant 0 : index
    %c0_2 = arith.constant 0 : index
    %1 = vector.load %arg0[%c0_1, %c0_2] : memref<64x16xf32, #tpu.memory_space<vmem>>, vector<64x16xf32>
    %c0_3 = arith.constant 0 : index
    %c0_4 = arith.constant 0 : index
    %2 = vector.load %arg1[%c0_3, %c0_4] : memref<16x128xf32, #tpu.memory_space<vmem>>, vector<16x128xf32>
    %cst = arith.constant dense<0.000000e+00> : vector<64x128xf32>
    %3 = tpu.matmul %1, %2, %cst {dimension_numbers = #tpu.dot_dimension_numbers<[1], [0], [0], [1], [0, 0, 1, 1], [], []>} : vector<64x16xf32>, vector<16x128xf32>, vector<64x128xf32> -> vector<64x128xf32>
    %c0_5 = arith.constant 0 : index
    %c0_6 = arith.constant 0 : index
    %4 = vector.load %arg3[%c0_5, %c0_6] : memref<1x128xf32, #tpu.memory_space<vmem>>, vector<1x128xf32>
    %5 = vector.broadcast %4 : vector<1x128xf32> to vector<64x128xf32>
    %6 = arith.addf %3, %5 : vector<64x128xf32>
    %c0_7 = arith.constant 0 : index
    %c0_8 = arith.constant 0 : index
    %7 = vector.load %arg5[%c0_7, %c0_8] : memref<64x128xf32, #tpu.memory_space<vmem>>, vector<64x128xf32>
    tpu.vector_store %arg5[%c0_7, %c0_8], %6 {strides = array<i32>} : memref<64x128xf32, #tpu.memory_space<vmem>>, vector<64x128xf32>,
    %cst_9 = arith.constant 0.000000e+00 : f32
    %8 = vector.broadcast %cst_9 : f32 to vector<8x32xf32>
    %cst_10 = arith.constant 0.000000e+00 : f32
    %9 = vector.broadcast %cst_10 : f32 to vector<8x32xf32>
    %c0_11 = arith.constant 0 : index
    %c0_12 = arith.constant 0 : index
    %10 = tpu.strided_load %arg5[%c0_11, %c0_12] {strides = array<i32: 8, 1>} : memref<64x128xf32, #tpu.memory_space<vmem>>, vector<8x128xf32>
    %cst_13 = arith.constant dense<0.000000e+00> : vector<8x128xf32>
    %11 = tpu.matmul %8, %0, %cst_13 {dimension_numbers = #tpu.dot_dimension_numbers<[1], [0], [0], [1], [0, 0, 1, 1], [], []>} : vector<8x32xf32>, vector<32x128xf32>, vector<8x128xf32> -> vector<8x128xf32>
    %12 = arith.addf %10, %11 : vector<8x128xf32>
    %13 = math.tanh %12 : vector<8x128xf32>
    %14 = vector.extract_strided_slice %13 {offsets = [0, 0], sizes = [8, 32], strides = [1, 1]} : vector<8x128xf32> to vector<8x32xf32>
    %cst_14 = arith.constant 1.000000e+00 : f32
    %15 = vector.broadcast %cst_14 : f32 to vector<8x32xf32>
    %16 = arith.addf %14, %15 : vector<8x32xf32>
    %cst_15 = arith.constant 5.000000e-01 : f32
    %17 = vector.broadcast %cst_15 : f32 to vector<8x32xf32>
    %18 = arith.mulf %17, %16 : vector<8x32xf32>
    %19 = vector.extract_strided_slice %13 {offsets = [0, 32], sizes = [8, 32], strides = [1, 1]} : vector<8x128xf32> to vector<8x32xf32>
    %cst_16 = arith.constant 1.000000e+00 : f32
    %20 = vector.broadcast %cst_16 : f32 to vector<8x32xf32>
    %21 = arith.addf %19, %20 : vector<8x32xf32>
    %cst_17 = arith.constant 5.000000e-01 : f32
    %22 = vector.broadcast %cst_17 : f32 to vector<8x32xf32>
    %23 = arith.mulf %22, %21 : vector<8x32xf32>
    %24 = vector.extract_strided_slice %13 {offsets = [0, 64], sizes = [8, 32], strides = [1, 1]} : vector<8x128xf32> to vector<8x32xf32>
    %25 = vector.extract_strided_slice %13 {offsets = [0, 96], sizes = [8, 32], strides = [1, 1]} : vector<8x128xf32> to vector<8x32xf32>
    %cst_18 = arith.constant 1.000000e+00 : f32
    %26 = vector.broadcast %cst_18 : f32 to vector<8x32xf32>
    %27 = arith.addf %25, %26 : vector<8x32xf32>
    %cst_19 = arith.constant 5.000000e-01 : f32
    %28 = vector.broadcast %cst_19 : f32 to vector<8x32xf32>
    %29 = arith.mulf %28, %27 : vector<8x32xf32>
    %30 = arith.mulf %23, %9 : vector<8x32xf32>
    %31 = arith.mulf %18, %24 : vector<8x32xf32>
    %32 = arith.addf %30, %31 : vector<8x32xf32>
    %33 = math.tanh %32 : vector<8x32xf32>
    %34 = arith.mulf %29, %33 : vector<8x32xf32>
    %c1 = arith.constant 1 : index
    %c0_20 = arith.constant 0 : index
    %35 = tpu.strided_load %arg5[%c1, %c0_20] {strides = array<i32: 8, 1>} : memref<64x128xf32, #tpu.memory_space<vmem>>, vector<8x128xf32>
    %cst_21 = arith.constant dense<0.000000e+00> : vector<8x128xf32>
    %36 = tpu.matmul %34, %0, %cst_21 {dimension_numbers = #tpu.dot_dimension_numbers<[1], [0], [0], [1], [0, 0, 1, 1], [], []>} : vector<8x32xf32>, vector<32x128xf32>, vector<8x128xf32> -> vector<8x128xf32>
    %37 = arith.addf %35, %36 : vector<8x128xf32>
    %38 = math.tanh %37 : vector<8x128xf32>
    %39 = vector.extract_strided_slice %38 {offsets = [0, 0], sizes = [8, 32], strides = [1, 1]} : vector<8x128xf32> to vector<8x32xf32>
    %cst_22 = arith.constant 1.000000e+00 : f32
    %40 = vector.broadcast %cst_22 : f32 to vector<8x32xf32>
    %41 = arith.addf %39, %40 : vector<8x32xf32>
    %cst_23 = arith.constant 5.000000e-01 : f32
    %42 = vector.broadcast %cst_23 : f32 to vector<8x32xf32>
    %43 = arith.mulf %42, %41 : vector<8x32xf32>
    %44 = vector.extract_strided_slice %38 {offsets = [0, 32], sizes = [8, 32], strides = [1, 1]} : vector<8x128xf32> to vector<8x32xf32>
    %cst_24 = arith.constant 1.000000e+00 : f32
    %45 = vector.broadcast %cst_24 : f32 to vector<8x32xf32>
    %46 = arith.addf %44, %45 : vector<8x32xf32>
    %cst_25 = arith.constant 5.000000e-01 : f32
    %47 = vector.broadcast %cst_25 : f32 to vector<8x32xf32>
    %48 = arith.mulf %47, %46 : vector<8x32xf32>
    %49 = vector.extract_strided_slice %38 {offsets = [0, 64], sizes = [8, 32], strides = [1, 1]} : vector<8x128xf32> to vector<8x32xf32>
    %50 = vector.extract_strided_slice %38 {offsets = [0, 96], sizes = [8, 32], strides = [1, 1]} : vector<8x128xf32> to vector<8x32xf32>
    %cst_26 = arith.constant 1.000000e+00 : f32
    %51 = vector.broadcast %cst_26 : f32 to vector<8x32xf32>
    %52 = arith.addf %50, %51 : vector<8x32xf32>
    %cst_27 = arith.constant 5.000000e-01 : f32
    %53 = vector.broadcast %cst_27 : f32 to vector<8x32xf32>
    %54 = arith.mulf %53, %52 : vector<8x32xf32>
    %55 = arith.mulf %48, %32 : vector<8x32xf32>
    %56 = arith.mulf %43, %49 : vector<8x32xf32>
    %57 = arith.addf %55, %56 : vector<8x32xf32>
    %58 = math.tanh %57 : vector<8x32xf32>
    %59 = arith.mulf %54, %58 : vector<8x32xf32>
    %c2 = arith.constant 2 : index
    %c0_28 = arith.constant 0 : index
    %60 = tpu.strided_load %arg5[%c2, %c0_28] {strides = array<i32: 8, 1>} : memref<64x128xf32, #tpu.memory_space<vmem>>, vector<8x128xf32>
    %cst_29 = arith.constant dense<0.000000e+00> : vector<8x128xf32>
    %61 = tpu.matmul %59, %0, %cst_29 {dimension_numbers = #tpu.dot_dimension_numbers<[1], [0], [0], [1], [0, 0, 1, 1], [], []>} : vector<8x32xf32>, vector<32x128xf32>, vector<8x128xf32> -> vector<8x128xf32>
    %62 = arith.addf %60, %61 : vector<8x128xf32>
    %63 = math.tanh %62 : vector<8x128xf32>
    %64 = vector.extract_strided_slice %63 {offsets = [0, 0], sizes = [8, 32], strides = [1, 1]} : vector<8x128xf32> to vector<8x32xf32>
    %cst_30 = arith.constant 1.000000e+00 : f32
    %65 = vector.broadcast %cst_30 : f32 to vector<8x32xf32>
    %66 = arith.addf %64, %65 : vector<8x32xf32>
    %cst_31 = arith.constant 5.000000e-01 : f32
    %67 = vector.broadcast %cst_31 : f32 to vector<8x32xf32>
    %68 = arith.mulf %67, %66 : vector<8x32xf32>
    %69 = vector.extract_strided_slice %63 {offsets = [0, 32], sizes = [8, 32], strides = [1, 1]} : vector<8x128xf32> to vector<8x32xf32>
    %cst_32 = arith.constant 1.000000e+00 : f32
    %70 = vector.broadcast %cst_32 : f32 to vector<8x32xf32>
    %71 = arith.addf %69, %70 : vector<8x32xf32>
    %cst_33 = arith.constant 5.000000e-01 : f32
    %72 = vector.broadcast %cst_33 : f32 to vector<8x32xf32>
    %73 = arith.mulf %72, %71 : vector<8x32xf32>
    %74 = vector.extract_strided_slice %63 {offsets = [0, 64], sizes = [8, 32], strides = [1, 1]} : vector<8x128xf32> to vector<8x32xf32>
    %75 = vector.extract_strided_slice %63 {offsets = [0, 96], sizes = [8, 32], strides = [1, 1]} : vector<8x128xf32> to vector<8x32xf32>
    %cst_34 = arith.constant 1.000000e+00 : f32
    %76 = vector.broadcast %cst_34 : f32 to vector<8x32xf32>
    %77 = arith.addf %75, %76 : vector<8x32xf32>
    %cst_35 = arith.constant 5.000000e-01 : f32
    %78 = vector.broadcast %cst_35 : f32 to vector<8x32xf32>
    %79 = arith.mulf %78, %77 : vector<8x32xf32>
    %80 = arith.mulf %73, %57 : vector<8x32xf32>
    %81 = arith.mulf %68, %74 : vector<8x32xf32>
    %82 = arith.addf %80, %81 : vector<8x32xf32>
    %83 = math.tanh %82 : vector<8x32xf32>
    %84 = arith.mulf %79, %83 : vector<8x32xf32>
    %c3 = arith.constant 3 : index
    %c0_36 = arith.constant 0 : index
    %85 = tpu.strided_load %arg5[%c3, %c0_36] {strides = array<i32: 8, 1>} : memref<64x128xf32, #tpu.memory_space<vmem>>, vector<8x128xf32>
    %cst_37 = arith.constant dense<0.000000e+00> : vector<8x128xf32>
    %86 = tpu.matmul %84, %0, %cst_37 {dimension_numbers = #tpu.dot_dimension_numbers<[1], [0], [0], [1], [0, 0, 1, 1], [], []>} : vector<8x32xf32>, vector<32x128xf32>, vector<8x128xf32> -> vector<8x128xf32>
    %87 = arith.addf %85, %86 : vector<8x128xf32>
    %88 = math.tanh %87 : vector<8x128xf32>
    %89 = vector.extract_strided_slice %88 {offsets = [0, 0], sizes = [8, 32], strides = [1, 1]} : vector<8x128xf32> to vector<8x32xf32>
    %cst_38 = arith.constant 1.000000e+00 : f32
    %90 = vector.broadcast %cst_38 : f32 to vector<8x32xf32>
    %91 = arith.addf %89, %90 : vector<8x32xf32>
    %cst_39 = arith.constant 5.000000e-01 : f32
    %92 = vector.broadcast %cst_39 : f32 to vector<8x32xf32>
    %93 = arith.mulf %92, %91 : vector<8x32xf32>
    %94 = vector.extract_strided_slice %88 {offsets = [0, 32], sizes = [8, 32], strides = [1, 1]} : vector<8x128xf32> to vector<8x32xf32>
    %cst_40 = arith.constant 1.000000e+00 : f32
    %95 = vector.broadcast %cst_40 : f32 to vector<8x32xf32>
    %96 = arith.addf %94, %95 : vector<8x32xf32>
    %cst_41 = arith.constant 5.000000e-01 : f32
    %97 = vector.broadcast %cst_41 : f32 to vector<8x32xf32>
    %98 = arith.mulf %97, %96 : vector<8x32xf32>
    %99 = vector.extract_strided_slice %88 {offsets = [0, 64], sizes = [8, 32], strides = [1, 1]} : vector<8x128xf32> to vector<8x32xf32>
    %100 = vector.extract_strided_slice %88 {offsets = [0, 96], sizes = [8, 32], strides = [1, 1]} : vector<8x128xf32> to vector<8x32xf32>
    %cst_42 = arith.constant 1.000000e+00 : f32
    %101 = vector.broadcast %cst_42 : f32 to vector<8x32xf32>
    %102 = arith.addf %100, %101 : vector<8x32xf32>
    %cst_43 = arith.constant 5.000000e-01 : f32
    %103 = vector.broadcast %cst_43 : f32 to vector<8x32xf32>
    %104 = arith.mulf %103, %102 : vector<8x32xf32>
    %105 = arith.mulf %98, %82 : vector<8x32xf32>
    %106 = arith.mulf %93, %99 : vector<8x32xf32>
    %107 = arith.addf %105, %106 : vector<8x32xf32>
    %108 = math.tanh %107 : vector<8x32xf32>
    %109 = arith.mulf %104, %108 : vector<8x32xf32>
    %c4 = arith.constant 4 : index
    %c0_44 = arith.constant 0 : index
    %110 = tpu.strided_load %arg5[%c4, %c0_44] {strides = array<i32: 8, 1>} : memref<64x128xf32, #tpu.memory_space<vmem>>, vector<8x128xf32>
    %cst_45 = arith.constant dense<0.000000e+00> : vector<8x128xf32>
    %111 = tpu.matmul %109, %0, %cst_45 {dimension_numbers = #tpu.dot_dimension_numbers<[1], [0], [0], [1], [0, 0, 1, 1], [], []>} : vector<8x32xf32>, vector<32x128xf32>, vector<8x128xf32> -> vector<8x128xf32>
    %112 = arith.addf %110, %111 : vector<8x128xf32>
    %113 = math.tanh %112 : vector<8x128xf32>
    %114 = vector.extract_strided_slice %113 {offsets = [0, 0], sizes = [8, 32], strides = [1, 1]} : vector<8x128xf32> to vector<8x32xf32>
    %cst_46 = arith.constant 1.000000e+00 : f32
    %115 = vector.broadcast %cst_46 : f32 to vector<8x32xf32>
    %116 = arith.addf %114, %115 : vector<8x32xf32>
    %cst_47 = arith.constant 5.000000e-01 : f32
    %117 = vector.broadcast %cst_47 : f32 to vector<8x32xf32>
    %118 = arith.mulf %117, %116 : vector<8x32xf32>
    %119 = vector.extract_strided_slice %113 {offsets = [0, 32], sizes = [8, 32], strides = [1, 1]} : vector<8x128xf32> to vector<8x32xf32>
    %cst_48 = arith.constant 1.000000e+00 : f32
    %120 = vector.broadcast %cst_48 : f32 to vector<8x32xf32>
    %121 = arith.addf %119, %120 : vector<8x32xf32>
    %cst_49 = arith.constant 5.000000e-01 : f32
    %122 = vector.broadcast %cst_49 : f32 to vector<8x32xf32>
    %123 = arith.mulf %122, %121 : vector<8x32xf32>
    %124 = vector.extract_strided_slice %113 {offsets = [0, 64], sizes = [8, 32], strides = [1, 1]} : vector<8x128xf32> to vector<8x32xf32>
    %125 = vector.extract_strided_slice %113 {offsets = [0, 96], sizes = [8, 32], strides = [1, 1]} : vector<8x128xf32> to vector<8x32xf32>
    %cst_50 = arith.constant 1.000000e+00 : f32
    %126 = vector.broadcast %cst_50 : f32 to vector<8x32xf32>
    %127 = arith.addf %125, %126 : vector<8x32xf32>
    %cst_51 = arith.constant 5.000000e-01 : f32
    %128 = vector.broadcast %cst_51 : f32 to vector<8x32xf32>
    %129 = arith.mulf %128, %127 : vector<8x32xf32>
    %130 = arith.mulf %123, %107 : vector<8x32xf32>
    %131 = arith.mulf %118, %124 : vector<8x32xf32>
    %132 = arith.addf %130, %131 : vector<8x32xf32>
    %133 = math.tanh %132 : vector<8x32xf32>
    %134 = arith.mulf %129, %133 : vector<8x32xf32>
    %c5 = arith.constant 5 : index
    %c0_52 = arith.constant 0 : index
    %135 = tpu.strided_load %arg5[%c5, %c0_52] {strides = array<i32: 8, 1>} : memref<64x128xf32, #tpu.memory_space<vmem>>, vector<8x128xf32>
    %cst_53 = arith.constant dense<0.000000e+00> : vector<8x128xf32>
    %136 = tpu.matmul %134, %0, %cst_53 {dimension_numbers = #tpu.dot_dimension_numbers<[1], [0], [0], [1], [0, 0, 1, 1], [], []>} : vector<8x32xf32>, vector<32x128xf32>, vector<8x128xf32> -> vector<8x128xf32>
    %137 = arith.addf %135, %136 : vector<8x128xf32>
    %138 = math.tanh %137 : vector<8x128xf32>
    %139 = vector.extract_strided_slice %138 {offsets = [0, 0], sizes = [8, 32], strides = [1, 1]} : vector<8x128xf32> to vector<8x32xf32>
    %cst_54 = arith.constant 1.000000e+00 : f32
    %140 = vector.broadcast %cst_54 : f32 to vector<8x32xf32>
    %141 = arith.addf %139, %140 : vector<8x32xf32>
    %cst_55 = arith.constant 5.000000e-01 : f32
    %142 = vector.broadcast %cst_55 : f32 to vector<8x32xf32>
    %143 = arith.mulf %142, %141 : vector<8x32xf32>
    %144 = vector.extract_strided_slice %138 {offsets = [0, 32], sizes = [8, 32], strides = [1, 1]} : vector<8x128xf32> to vector<8x32xf32>
    %cst_56 = arith.constant 1.000000e+00 : f32
    %145 = vector.broadcast %cst_56 : f32 to vector<8x32xf32>
    %146 = arith.addf %144, %145 : vector<8x32xf32>
    %cst_57 = arith.constant 5.000000e-01 : f32
    %147 = vector.broadcast %cst_57 : f32 to vector<8x32xf32>
    %148 = arith.mulf %147, %146 : vector<8x32xf32>
    %149 = vector.extract_strided_slice %138 {offsets = [0, 64], sizes = [8, 32], strides = [1, 1]} : vector<8x128xf32> to vector<8x32xf32>
    %150 = vector.extract_strided_slice %138 {offsets = [0, 96], sizes = [8, 32], strides = [1, 1]} : vector<8x128xf32> to vector<8x32xf32>
    %cst_58 = arith.constant 1.000000e+00 : f32
    %151 = vector.broadcast %cst_58 : f32 to vector<8x32xf32>
    %152 = arith.addf %150, %151 : vector<8x32xf32>
    %cst_59 = arith.constant 5.000000e-01 : f32
    %153 = vector.broadcast %cst_59 : f32 to vector<8x32xf32>
    %154 = arith.mulf %153, %152 : vector<8x32xf32>
    %155 = arith.mulf %148, %132 : vector<8x32xf32>
    %156 = arith.mulf %143, %149 : vector<8x32xf32>
    %157 = arith.addf %155, %156 : vector<8x32xf32>
    %158 = math.tanh %157 : vector<8x32xf32>
    %159 = arith.mulf %154, %158 : vector<8x32xf32>
    %c6 = arith.constant 6 : index
    %c0_60 = arith.constant 0 : index
    %160 = tpu.strided_load %arg5[%c6, %c0_60] {strides = array<i32: 8, 1>} : memref<64x128xf32, #tpu.memory_space<vmem>>, vector<8x128xf32>
    %cst_61 = arith.constant dense<0.000000e+00> : vector<8x128xf32>
    %161 = tpu.matmul %159, %0, %cst_61 {dimension_numbers = #tpu.dot_dimension_numbers<[1], [0], [0], [1], [0, 0, 1, 1], [], []>} : vector<8x32xf32>, vector<32x128xf32>, vector<8x128xf32> -> vector<8x128xf32>
    %162 = arith.addf %160, %161 : vector<8x128xf32>
    %163 = math.tanh %162 : vector<8x128xf32>
    %164 = vector.extract_strided_slice %163 {offsets = [0, 0], sizes = [8, 32], strides = [1, 1]} : vector<8x128xf32> to vector<8x32xf32>
    %cst_62 = arith.constant 1.000000e+00 : f32
    %165 = vector.broadcast %cst_62 : f32 to vector<8x32xf32>
    %166 = arith.addf %164, %165 : vector<8x32xf32>
    %cst_63 = arith.constant 5.000000e-01 : f32
    %167 = vector.broadcast %cst_63 : f32 to vector<8x32xf32>
    %168 = arith.mulf %167, %166 : vector<8x32xf32>
    %169 = vector.extract_strided_slice %163 {offsets = [0, 32], sizes = [8, 32], strides = [1, 1]} : vector<8x128xf32> to vector<8x32xf32>
    %cst_64 = arith.constant 1.000000e+00 : f32
    %170 = vector.broadcast %cst_64 : f32 to vector<8x32xf32>
    %171 = arith.addf %169, %170 : vector<8x32xf32>
    %cst_65 = arith.constant 5.000000e-01 : f32
    %172 = vector.broadcast %cst_65 : f32 to vector<8x32xf32>
    %173 = arith.mulf %172, %171 : vector<8x32xf32>
    %174 = vector.extract_strided_slice %163 {offsets = [0, 64], sizes = [8, 32], strides = [1, 1]} : vector<8x128xf32> to vector<8x32xf32>
    %175 = vector.extract_strided_slice %163 {offsets = [0, 96], sizes = [8, 32], strides = [1, 1]} : vector<8x128xf32> to vector<8x32xf32>
    %cst_66 = arith.constant 1.000000e+00 : f32
    %176 = vector.broadcast %cst_66 : f32 to vector<8x32xf32>
    %177 = arith.addf %175, %176 : vector<8x32xf32>
    %cst_67 = arith.constant 5.000000e-01 : f32
    %178 = vector.broadcast %cst_67 : f32 to vector<8x32xf32>
    %179 = arith.mulf %178, %177 : vector<8x32xf32>
    %180 = arith.mulf %173, %157 : vector<8x32xf32>
    %181 = arith.mulf %168, %174 : vector<8x32xf32>
    %182 = arith.addf %180, %181 : vector<8x32xf32>
    %183 = math.tanh %182 : vector<8x32xf32>
    %184 = arith.mulf %179, %183 : vector<8x32xf32>
    %c7 = arith.constant 7 : index
    %c0_68 = arith.constant 0 : index
    %185 = tpu.strided_load %arg5[%c7, %c0_68] {strides = array<i32: 8, 1>} : memref<64x128xf32, #tpu.memory_space<vmem>>, vector<8x128xf32>
    %cst_69 = arith.constant dense<0.000000e+00> : vector<8x128xf32>
    %186 = tpu.matmul %184, %0, %cst_69 {dimension_numbers = #tpu.dot_dimension_numbers<[1], [0], [0], [1], [0, 0, 1, 1], [], []>} : vector<8x32xf32>, vector<32x128xf32>, vector<8x128xf32> -> vector<8x128xf32>
    %187 = arith.addf %185, %186 : vector<8x128xf32>
    %188 = math.tanh %187 : vector<8x128xf32>
    %189 = vector.extract_strided_slice %188 {offsets = [0, 0], sizes = [8, 32], strides = [1, 1]} : vector<8x128xf32> to vector<8x32xf32>
    %cst_70 = arith.constant 1.000000e+00 : f32
    %190 = vector.broadcast %cst_70 : f32 to vector<8x32xf32>
    %191 = arith.addf %189, %190 : vector<8x32xf32>
    %cst_71 = arith.constant 5.000000e-01 : f32
    %192 = vector.broadcast %cst_71 : f32 to vector<8x32xf32>
    %193 = arith.mulf %192, %191 : vector<8x32xf32>
    %194 = vector.extract_strided_slice %188 {offsets = [0, 32], sizes = [8, 32], strides = [1, 1]} : vector<8x128xf32> to vector<8x32xf32>
    %cst_72 = arith.constant 1.000000e+00 : f32
    %195 = vector.broadcast %cst_72 : f32 to vector<8x32xf32>
    %196 = arith.addf %194, %195 : vector<8x32xf32>
    %cst_73 = arith.constant 5.000000e-01 : f32
    %197 = vector.broadcast %cst_73 : f32 to vector<8x32xf32>
    %198 = arith.mulf %197, %196 : vector<8x32xf32>
    %199 = vector.extract_strided_slice %188 {offsets = [0, 64], sizes = [8, 32], strides = [1, 1]} : vector<8x128xf32> to vector<8x32xf32>
    %200 = vector.extract_strided_slice %188 {offsets = [0, 96], sizes = [8, 32], strides = [1, 1]} : vector<8x128xf32> to vector<8x32xf32>
    %cst_74 = arith.constant 1.000000e+00 : f32
    %201 = vector.broadcast %cst_74 : f32 to vector<8x32xf32>
    %202 = arith.addf %200, %201 : vector<8x32xf32>
    %cst_75 = arith.constant 5.000000e-01 : f32
    %203 = vector.broadcast %cst_75 : f32 to vector<8x32xf32>
    %204 = arith.mulf %203, %202 : vector<8x32xf32>
    %205 = arith.mulf %198, %182 : vector<8x32xf32>
    %206 = arith.mulf %193, %199 : vector<8x32xf32>
    %207 = arith.addf %205, %206 : vector<8x32xf32>
    %208 = math.tanh %207 : vector<8x32xf32>
    %209 = arith.mulf %204, %208 : vector<8x32xf32>
    %210 = vector.extract_strided_slice %209 {offsets = [0, 0], sizes = [8, 24], strides = [1, 1]} : vector<8x32xf32> to vector<8x24xf32>
    %c0_76 = arith.constant 0 : index
    %c0_77 = arith.constant 0 : index
    %211 = vector.load %arg4[%c0_76, %c0_77] : memref<8x24xf32, #tpu.memory_space<vmem>>, vector<8x24xf32>
    tpu.vector_store %arg4[%c0_76, %c0_77], %210 {strides = array<i32>} : memref<8x24xf32, #tpu.memory_space<vmem>>, vector<8x24xf32>,
    return
  }
}

</mosaic_0001>

<bundles_post_ra>
// kernel: lstm_block_forward.1
= control target key start
LH: loop header
LB: loop body
LE: loop exit
PB: predicated region body
PF: predicated region fallthrough
CT: control target
= control target key end

     0   :  { %9 = vsyncpa [#allocation4], 0  ;;  %s1522_s0 = inlined_call_operand.hbm [shape: f32[64,16], index: 0, kind: input, shape index: {}]   ;;  %s1523_s1 = inlined_call_operand.hbm [shape: f32[16,128], index: 1, kind: input, shape index: {}]   ;;  %s1524_s2 = inlined_call_operand.hbm [shape: f32[32,128], index: 2, kind: input, shape index: {}]   ;;  %s1525_s3 = inlined_call_operand.vmem [shape: f32[1,128], index: 3, kind: input, shape index: {}]   ;;  %s1526_s4 = inlined_call_operand.hbm [shape: f32[8,24], index: 4, kind: output, shape index: {}]  }
   0x1   :  { %10 = vsyncpa [#allocation7], 0 }
   0x2   :  { %11 = vsyncpa [#allocation5], 0  ;;  %s1336_s15 = smov [#allocation6]   ;;  %s1337_s17 = smov [#allocation3]  }
   0x3   :  { %s29_s16 = sshll.u32 %s1336_s15, 4  ;;  %s17_s18 = sshll.u32 %s1337_s17, 4  ;;  %s30_s16 = int_to_ptr.vmem [resolvable:$true] %s29_s16  ;;  %s18_s18 = int_to_ptr.vmem [resolvable:$true] %s17_s18 }
   0x4   :  { %s1258_s19 = scalar_lea.vmem %s30_s16, 256  ;;  %p1263_p1 = scmp.lt.s32.totalorder %s30_s16, %s30_s16 }
   0x5   :  { %p1259_p0 = scmp.ne.s32.totalorder %s30_s16, %s1258_s19  ;;  %p1264_p2 = scmp.lt.s32.totalorder %s1258_s19, %s1258_s19 }
   0x7   :  { %p1265_p3 = por %p1264_p2, %p1263_p1 }
   0x9   :  { %p1266_p4 = pnand %p1265_p3, %p1259_p0 }
   0xb   :  { %1269 = shalt.err (!%p1266_p4)
}
   0xc   :  { %s1338_s20 = smov 128   ;;  %s1339_s21 = smov 8  }
   0xd   :  { %35 = dma.hbm_to_vmem [thread:$0]  %s1523_s1, 256, %s30_s16, [#allocation7], %s1338_s20, %s1338_s20, %s1339_s21  }
   0xe   :  { %s1278_s24 = scalar_lea.vmem %s18_s18, 1024  ;;  %p1283_p6 = scmp.lt.s32.totalorder %s18_s18, %s18_s18 }
   0xf   :  { %p1279_p5 = scmp.ne.s32.totalorder %s18_s18, %s1278_s24  ;;  %p1284_p7 = scmp.lt.s32.totalorder %s1278_s24, %s1278_s24 }
  0x11   :  { %p1285_p8 = por %p1284_p7, %p1283_p6 }
  0x13   :  { %p1286_p9 = pnand %p1285_p8, %p1279_p5 }
  0x15   :  { %1289 = shalt.err (!%p1286_p9)
}
  0x16   :  { %23 = dma.hbm_to_vmem [thread:$0]  %s1522_s0, 1024, %s18_s18, [#allocation4], %s1338_s20, %s1338_s20, %s1339_s21  }
  0x17   :  { %s1340_s27 = smov [#allocation8]  }
  0x18   :  { %s41_s28 = sshll.u32 %s1340_s27, 4  ;;  %s42_s28 = int_to_ptr.vmem [resolvable:$true] %s41_s28 }
  0x19   :  { %s1298_s29 = scalar_lea.vmem %s42_s28, 512  ;;  %p1303_p11 = scmp.lt.s32.totalorder %s42_s28, %s42_s28 }
  0x1a   :  { %p1299_p10 = scmp.ne.s32.totalorder %s42_s28, %s1298_s29  ;;  %p1304_p12 = scmp.lt.s32.totalorder %s1298_s29, %s1298_s29 }
  0x1c   :  { %p1305_p13 = por %p1304_p12, %p1303_p11 }
  0x1e   :  { %p1306_p0 = pnand %p1305_p13, %p1299_p10 }
  0x20   :  { %1309 = shalt.err (!%p1306_p0)
}
  0x21   :  { %47 = dma.hbm_to_vmem [thread:$0]  %s1524_s2, 512, %s42_s28, [#allocation7], %s1338_s20, %s1338_s20, %s1339_s21  }
  0x22   :  { %1330 = dma.done.wait [#allocation4], 1024  }
  0x23   :  { %1331 = vsyncadd [#allocation4], 4294966272 }
  0x24   :  { %1332 = dma.done.wait [#allocation7], 768  }
  0x25   :  { %1333 = vsyncadd [#allocation7], 4294966528  ;;  %v1341_v0 = vmov 0.0   ;;  %vm1342_vm0 = vmmov 0   ;;  %vm80_vm1 = vcmask 130048   ;;  %v72_v1 = vld [vmem:[#allocation6 + $0x8] sm:$0xff] }
  0x26   :  { %1120 = vmatprep.subr.mxu1 %v1341_v0  ;;  %1128 = vmatprep.mubr.msk.f32.mxu1 %vm1342_vm0, %v1341_v0  ;;  %v71_v2 = vld [vmem:[#allocation6] sm:$0xff]  ;;  %v64_v4 = vld [vmem:[#allocation3 + $0x8] sm:$0xff]  ;;  %v65_v5 = vld [vmem:[#allocation3 + $0x10] sm:$0xff]  ;;  %s1344_s5 = smov 32   ;;  %vm221_vm2 = vcmask 261120   ;;  %s1345_s6 = smov [#allocation9]  }
  0x27   :  { %v63_v3 = vld [vmem:[#allocation3] sm:$0xff]  ;;  %1104 = vmatprep.subr.mxu0 %v72_v1  ;;  %v1384_v6 = vld [vmem:[#allocation8 + $0x18] sm:$0xff]  ;;  %v1391_v8 = vld [vmem:[#allocation8 + $0x8] sm:$0xff]  ;;  %s1028_s7 = sshll.u32 %s1345_s6, 4  ;;  %vm1020_vm3 = vcmask 195584   ;;  %s1029_s7 = int_to_ptr.vmem [resolvable:$true] %s1028_s7 }
  0x28   :  { %1108 = vmatprep.mubr.msk.f32.mxu0 %vm80_vm1, %v63_v3  ;;  %1105 = vmatpush3.msra.mxu0 %v72_v1  ;;  %v1386_v7 = vld [vmem:[#allocation8 + $0x10] sm:$0xff]  ;;  %v66_v9 = vld [vmem:[#allocation3 + $0x18] sm:$0xff]  ;;  %v1396_v11 = vld [vmem:[#allocation8] sm:$0xff]  ;;  %s1310_s8 = scalar_lea.vmem %s1029_s7, 128  ;;  %p1315_p2 = scmp.lt.s32.totalorder %s1029_s7, %s1029_s7 }
  0x29   :  { %1106 = vmatprep.subr.mxu0 %v71_v2  ;;  %1121 = vmatpush3.msra.mxu1 %v1384_v6  ;;  %v67_v10 = vld [vmem:[#allocation3 + $0x20] sm:$0xff]  ;;  %v68_v12 = vld [vmem:[#allocation3 + $0x28] sm:$0xff]  ;;  %v69_v13 = vld [vmem:[#allocation3 + $0x30] sm:$0xff]  ;;  %p1311_p1 = scmp.ne.s32.totalorder %s1029_s7, %s1310_s8  ;;  %p1316_p3 = scmp.lt.s32.totalorder %s1310_s8, %s1310_s8 }
  0x2a   :  { %1107 = vmatpush3.msra.mxu0 %v71_v2  ;;  %1122 = vmatprep.subr.mxu1 %v1341_v0  ;;  %v70_v14 = vld [vmem:[#allocation3 + $0x38] sm:$0xff]  ;;  %v1038_v15 = vld [vmem:[%s1525_s3] ss:$0 sm:$0xff]  ;;  %s1343_s3 = smov 64  }
  0x2b   :  { %1109 = vmatmul.mubr.msk.f32.vlgmr.msra.gmra.mxu0 %vm80_vm1, %v64_v4  ;;  %1123 = vmatpush3.msra.mxu1 %v1386_v7  ;;  %p1317_p4 = por %p1316_p3, %p1315_p2 }
  0x2c   :  { %1111 = vmatprep.mubr.msk.f32.mxu0 %vm80_vm1, %v65_v5  ;;  %1124 = vmatprep.subr.mxu1 %v1341_v0 }
  0x2d   :  { %1142 = vmatprep.subr.mxu0 %v1341_v0  ;;  %1125 = vmatpush3.msra.mxu1 %v1391_v8  ;;  %p1318_p5 = pnand %p1317_p4, %p1311_p1 }
  0x2e   :  { %1143 = vmatpush3.msra.mxu0 %v1384_v6  ;;  %1126 = vmatprep.subr.mxu1 %v1341_v0 }
  0x2f   :  { %1112 = vmatmul.mubr.msk.f32.gmra.mxu0 %vm80_vm1, %v66_v9  ;;  %1127 = vmatpush3.msra.mxu1 %v1396_v11 }
  0x30   :  { %1114 = vmatprep.mubr.msk.f32.mxu0 %vm80_vm1, %v67_v10  ;;  %1129 = vmatmul.mubr.f32.vlgmr.msra.gmra.mxu1 %v1341_v0 }
  0x31   :  { %1131 = vmatprep.subr.mxu1 %v1341_v0  ;;  %1139 = vmatprep.mubr.msk.f32.mxu1 %vm1342_vm0, %v1341_v0 }
  0x32   :  { %1132 = vmatpush3.msra.mxu1 %v1384_v6  ;;  %1144 = vmatprep.subr.mxu0 %v1341_v0 }
  0x33   :  { %1115 = vmatmul.mubr.msk.f32.gmra.mxu0 %vm80_vm1, %v68_v12  ;;  %1133 = vmatprep.subr.mxu1 %v1341_v0 }
  0x34   :  { %1117 = vmatprep.mubr.msk.f32.mxu0 %vm80_vm1, %v69_v13  ;;  %1134 = vmatpush3.msra.mxu1 %v1386_v7 }
  0x35   :  { %1135 = vmatprep.subr.mxu1 %v1341_v0  ;;  %1145 = vmatpush3.msra.mxu0 %v1386_v7 }
  0x36   :  { %1136 = vmatpush3.msra.mxu1 %v1391_v8  ;;  %1146 = vmatprep.subr.mxu0 %v1341_v0 }
  0x37   :  { %1118 = vmatmul.mubr.msk.f32.gmra.mxu0 %vm80_vm1, %v70_v14  ;;  %1137 = vmatprep.subr.mxu1 %v1341_v0 }
  0x38   :  { %1138 = vmatpush3.msra.mxu1 %v1396_v11  ;;  %1147 = vmatpush3.msra.mxu0 %v1391_v8 }
  0x39   :  { %1150 = vmatprep.mubr.msk.f32.mxu0 %vm1342_vm0, %v1341_v0  ;;  %1148 = vmatprep.subr.mxu0 %v1341_v0 }
  0x3a   :  { %1153 = vmatprep.subr.mxu1 %v1341_v0  ;;  %1149 = vmatpush3.msra.mxu0 %v1396_v11 }
  0x3b   :  { %1164 = vmatprep.subr.mxu0 %v1341_v0 }
  0xeb   :  { %v1110_v16 = vpop.f32.mrf.mxu0 }
  0xec   :  { %v177_v17 = vadd.f32 %v1110_v16, %v1038_v15 }
  0xed   :  { %v171_v18 = vpop.f32.mrf.mxu0 }
  0xee   :  { %211 = vst [vmem:[#allocation2 + $0x8] sm:$0xff] %v177_v17  ;;  %v172_v19 = vadd.f32 %v1038_v15, %v171_v18 }
  0xef   :  { %v1113_v20 = vpop.f32.mrf.mxu0 }
  0xf0   :  { %210 = vst [vmem:[#allocation2] sm:$0xff] %v172_v19  ;;  %v187_v21 = vadd.f32 %v1113_v20, %v1038_v15  ;;  %v291_v23 = vpop.f32.mrf.mxu1 }
  0xf1   :  { %v181_v22 = vpop.f32.mrf.mxu0 }
  0xf2   :  { %213 = vst [vmem:[#allocation2 + $0x18] sm:$0xff] %v187_v21  ;;  %v182_v24 = vadd.f32 %v1038_v15, %v181_v22  ;;  %v1130_v26 = vpop.f32.mrf.mxu1 }
  0xf3   :  { %v1116_v25 = vpop.f32.mrf.mxu0 }
  0xf4   :  { %212 = vst [vmem:[#allocation2 + $0x10] sm:$0xff] %v182_v24  ;;  %v197_v27 = vadd.f32 %v1116_v25, %v1038_v15 }
  0xf5   :  { %v191_v28 = vpop.f32.mrf.mxu0 }
  0xf6   :  { %215 = vst [vmem:[#allocation2 + $0x28] sm:$0xff] %v197_v27  ;;  %v192_v29 = vadd.f32 %v1038_v15, %v191_v28 }
  0xf7   :  { %v1119_v30 = vpop.f32.mrf.mxu0 }
  0xf8   :  { %214 = vst [vmem:[#allocation2 + $0x20] sm:$0xff] %v192_v29  ;;  %v207_v31 = vadd.f32 %v1119_v30, %v1038_v15 }
  0xf9   :  { %v201_v32 = vpop.f32.mrf.mxu0 }
  0xfa   :  { %217 = vst [vmem:[#allocation2 + $0x38] sm:$0xff] %v207_v31  ;;  %v202_v33 = vadd.f32 %v1038_v15, %v201_v32 }
  0xfb   :  { %v218_v34 = vld [vmem:[#allocation2] ss:$8 sm:$0xf]  ;;  %v317_v51 = vld [vmem:[#allocation2 + $0x1] ss:$8 sm:$0xf] }
  0xfc   :  { %216 = vst [vmem:[#allocation2 + $0x30] sm:$0xff] %v202_v33  ;;  %v417_v9 = vld [vmem:[#allocation2 + $0x2] ss:$8 sm:$0xf] }
  0xfd   :  { %v517_v28 = vld [vmem:[#allocation2 + $0x3] ss:$8 sm:$0xf] }
 0x103   :  { %v219_v35 = vld [vmem:[#allocation2] ss:$8 sm:$0xf0]  ;;  %v318_v50 = vld [vmem:[#allocation2 + $0x1] ss:$8 sm:$0xf0] }
 0x104   :  { %v220_v36 = vor.u32 %v219_v35, %v218_v34  ;;  %v319_v52 = vor.u32 %v318_v50, %v317_v51  ;;  %v418_v5 = vld [vmem:[#allocation2 + $0x2] ss:$8 sm:$0xf0]  ;;  %v518_v27 = vld [vmem:[#allocation2 + $0x3] ss:$8 sm:$0xf0] }
 0x105   :  { %v419_v10 = vor.u32 %v418_v5, %v417_v9  ;;  %v519_v29 = vor.u32 %v518_v27, %v517_v28 }
 0x106   :  { %v295_v37 = vadd.f32 %v291_v23, %v220_v36 }
 0x108   :  { %1218 = vtanh.f32 %v295_v37 }
 0x115   :  { %v1219_v38 = vpop.eup %1218 }
 0x116   :  { %301 = vrot.lane.b32.xlu0 %v1219_v38, %s1343_s3  ;;  %v297_v39 = vadd.f32 1.0, %v1219_v38 }
 0x118   :  { %v298_v40 = vmul.f32 0.5, %v297_v39 }
 0x11a   :  { %v299_v43 = vmul.f32 0.0, %v298_v40 }
 0x188   :  { %v302_v41 = vpop.permute.xlu0 %301 }
 0x189   :  { %v304_v42 = vmul.f32 %v302_v41, %v298_v40 }
 0x18b   :  { %306 = vrot.lane.b32.xlu0 %v304_v42, %s1344_s5 }
 0x1fd   :  { %v307_v44 = vpop.permute.xlu0 %306 }
 0x1fe   :  { %v309_v45 = vadd.f32 %v307_v44, %v299_v43 }
 0x200   :  { %1220 = vtanh.f32 %v309_v45 }
 0x20d   :  { %v1221_v46 = vpop.eup %1220 }
 0x20e   :  { %312 = vrot.lane.b32.xlu1 %v1221_v46, %s1343_s3  ;;  %v617_v46 = vld [vmem:[#allocation2 + $0x4] ss:$8 sm:$0xf] }
 0x280   :  { %v313_v47 = vpop.permute.xlu1 %312 }
 0x281   :  { %v315_v48 = vmul.f32 %v313_v47, %v298_v40 }
 0x283   :  { %321 = vrot.lane.b32.xlu1 %v315_v48, %s1344_s5 }
 0x2f5   :  { %v322_v49 = vpop.permute.xlu1 %321 }
 0x2f6   :  { %1140 = vmatmul.mubr.msk.f32.vlgmr.msra.gmra.mxu1 %vm221_vm2, %v322_v49 }
 0x2f7   :  { %1154 = vmatpush3.msra.mxu1 %v1384_v6  ;;  %1161 = vmatprep.mubr.msk.f32.mxu1 %vm1342_vm0, %v1341_v0 }
 0x2f8   :  { %1155 = vmatprep.subr.mxu1 %v1341_v0 }
 0x2f9   :  { %1156 = vmatpush3.msra.mxu1 %v1386_v7 }
 0x2fa   :  { %1157 = vmatprep.subr.mxu1 %v1341_v0 }
 0x2fb   :  { %1158 = vmatpush3.msra.mxu1 %v1391_v8 }
 0x2fc   :  { %1159 = vmatprep.subr.mxu1 %v1341_v0 }
 0x2fd   :  { %1160 = vmatpush3.msra.mxu1 %v1396_v11 }
 0x2fe   :  { %1175 = vmatprep.subr.mxu1 %v1341_v0 }
 0x3b6   :  { %v391_v53 = vpop.f32.mrf.mxu1 }
 0x3b7   :  { %v395_v54 = vadd.f32 %v391_v53, %v319_v52 }
 0x3b8   :  { %v1141_v55 = vpop.f32.mrf.mxu1 }
 0x3b9   :  { %1222 = vtanh.f32 %v395_v54 }
 0x3c6   :  { %v1223_v56 = vpop.eup %1222 }
 0x3c7   :  { %401 = vrot.lane.b32.xlu0 %v1223_v56, %s1343_s3  ;;  %v397_v57 = vadd.f32 1.0, %v1223_v56 }
 0x3c9   :  { %v398_v58 = vmul.f32 0.5, %v397_v57 }
 0x3cb   :  { %v399_v61 = vmul.f32 %v398_v58, %v309_v45  ;;  %v618_v45 = vld [vmem:[#allocation2 + $0x4] ss:$8 sm:$0xf0] }
 0x3cc   :  { %v619_v47 = vor.u32 %v618_v45, %v617_v46 }
 0x439   :  { %v402_v59 = vpop.permute.xlu0 %401 }
 0x43a   :  { %v404_v60 = vmul.f32 %v402_v59, %v398_v58 }
 0x43c   :  { %406 = vrot.lane.b32.xlu1 %v404_v60, %s1344_s5 }
 0x4ae   :  { %v407_v62 = vpop.permute.xlu1 %406 }
 0x4af   :  { %v409_v63 = vadd.f32 %v407_v62, %v399_v61 }
 0x4b1   :  { %1224 = vtanh.f32 %v409_v63 }
 0x4be   :  { %v1225_v1 = vpop.eup %1224 }
 0x4bf   :  { %412 = vrot.lane.b32.xlu0 %v1225_v1, %s1343_s3  ;;  %v717_v1 = vld [vmem:[#allocation2 + $0x5] ss:$8 sm:$0xf] }
 0x531   :  { %v413_v2 = vpop.permute.xlu0 %412 }
 0x532   :  { %v415_v3 = vmul.f32 %v413_v2, %v398_v58 }
 0x534   :  { %421 = vrot.lane.b32.xlu1 %v415_v3, %s1344_s5 }
 0x5a6   :  { %v422_v4 = vpop.permute.xlu1 %421 }
 0x5a7   :  { %1151 = vmatmul.mubr.msk.f32.vlgmr.msra.gmra.mxu0 %vm221_vm2, %v422_v4 }
 0x5a8   :  { %1165 = vmatpush3.msra.mxu0 %v1384_v6  ;;  %1172 = vmatprep.mubr.msk.f32.mxu0 %vm1342_vm0, %v1341_v0 }
 0x5a9   :  { %1166 = vmatprep.subr.mxu0 %v1341_v0 }
 0x5aa   :  { %1167 = vmatpush3.msra.mxu0 %v1386_v7 }
 0x5ab   :  { %1168 = vmatprep.subr.mxu0 %v1341_v0 }
 0x5ac   :  { %1169 = vmatpush3.msra.mxu0 %v1391_v8 }
 0x5ad   :  { %1170 = vmatprep.subr.mxu0 %v1341_v0 }
 0x5ae   :  { %1171 = vmatpush3.msra.mxu0 %v1396_v11 }
 0x5af   :  { %1186 = vmatprep.subr.mxu0 %v1341_v0 }
 0x667   :  { %v491_v12 = vpop.f32.mrf.mxu0 }
 0x668   :  { %v495_v13 = vadd.f32 %v491_v12, %v419_v10 }
 0x669   :  { %v1152_v14 = vpop.f32.mrf.mxu0 }
 0x66a   :  { %1226 = vtanh.f32 %v495_v13 }
 0x677   :  { %v1227_v15 = vpop.eup %1226 }
 0x678   :  { %501 = vrot.lane.b32.xlu0 %v1227_v15, %s1343_s3  ;;  %v497_v16 = vadd.f32 1.0, %v1227_v15 }
 0x67a   :  { %v498_v17 = vmul.f32 0.5, %v497_v16 }
 0x67c   :  { %v499_v20 = vmul.f32 %v498_v17, %v409_v63  ;;  %v718_v63 = vld [vmem:[#allocation2 + $0x5] ss:$8 sm:$0xf0] }
 0x67d   :  { %v719_v2 = vor.u32 %v718_v63, %v717_v1 }
 0x6ea   :  { %v502_v18 = vpop.permute.xlu0 %501 }
 0x6eb   :  { %v504_v19 = vmul.f32 %v502_v18, %v498_v17  ;;  %v817_v18 = vld [vmem:[#allocation2 + $0x6] ss:$8 sm:$0xf] }
 0x6ed   :  { %506 = vrot.lane.b32.xlu1 %v504_v19, %s1344_s5 }
 0x75f   :  { %v507_v21 = vpop.permute.xlu1 %506 }
 0x760   :  { %v509_v22 = vadd.f32 %v507_v21, %v499_v20 }
 0x762   :  { %1228 = vtanh.f32 %v509_v22 }
 0x76f   :  { %v1229_v23 = vpop.eup %1228 }
 0x770   :  { %512 = vrot.lane.b32.xlu0 %v1229_v23, %s1343_s3 }
 0x7e2   :  { %v513_v24 = vpop.permute.xlu0 %512 }
 0x7e3   :  { %v515_v25 = vmul.f32 %v513_v24, %v498_v17  ;;  %v818_v17 = vld [vmem:[#allocation2 + $0x6] ss:$8 sm:$0xf0] }
 0x7e4   :  { %v819_v19 = vor.u32 %v818_v17, %v817_v18 }
 0x7e5   :  { %521 = vrot.lane.b32.xlu1 %v515_v25, %s1344_s5 }
 0x857   :  { %v522_v26 = vpop.permute.xlu1 %521 }
 0x858   :  { %1162 = vmatmul.mubr.msk.f32.vlgmr.msra.gmra.mxu1 %vm221_vm2, %v522_v26 }
 0x859   :  { %1176 = vmatpush3.msra.mxu1 %v1384_v6  ;;  %1183 = vmatprep.mubr.msk.f32.mxu1 %vm1342_vm0, %v1341_v0 }
 0x85a   :  { %1177 = vmatprep.subr.mxu1 %v1341_v0 }
 0x85b   :  { %1178 = vmatpush3.msra.mxu1 %v1386_v7 }
 0x85c   :  { %1179 = vmatprep.subr.mxu1 %v1341_v0 }
 0x85d   :  { %1180 = vmatpush3.msra.mxu1 %v1391_v8 }
 0x85e   :  { %1181 = vmatprep.subr.mxu1 %v1341_v0 }
 0x85f   :  { %1182 = vmatpush3.msra.mxu1 %v1396_v11 }
 0x860   :  { %1197 = vmatprep.subr.mxu1 %v1341_v0 }
 0x918   :  { %v591_v30 = vpop.f32.mrf.mxu1 }
 0x919   :  { %v595_v31 = vadd.f32 %v591_v30, %v519_v29 }
 0x91a   :  { %v1163_v32 = vpop.f32.mrf.mxu1 }
 0x91b   :  { %1230 = vtanh.f32 %v595_v31 }
 0x928   :  { %v1231_v33 = vpop.eup %1230 }
 0x929   :  { %601 = vrot.lane.b32.xlu0 %v1231_v33, %s1343_s3  ;;  %v597_v34 = vadd.f32 1.0, %v1231_v33 }
 0x92b   :  { %v598_v35 = vmul.f32 0.5, %v597_v34 }
 0x92d   :  { %v599_v38 = vmul.f32 %v598_v35, %v509_v22 }
 0x99b   :  { %v602_v36 = vpop.permute.xlu0 %601 }
 0x99c   :  { %v604_v37 = vmul.f32 %v602_v36, %v598_v35  ;;  %v917_v36 = vld [vmem:[#allocation2 + $0x7] ss:$8 sm:$0xf] }
 0x99e   :  { %606 = vrot.lane.b32.xlu1 %v604_v37, %s1344_s5 }
 0xa10   :  { %v607_v39 = vpop.permute.xlu1 %606 }
 0xa11   :  { %v609_v40 = vadd.f32 %v607_v39, %v599_v38 }
 0xa13   :  { %1232 = vtanh.f32 %v609_v40 }
 0xa20   :  { %v1233_v41 = vpop.eup %1232 }
 0xa21   :  { %612 = vrot.lane.b32.xlu0 %v1233_v41, %s1343_s3 }
 0xa93   :  { %v613_v42 = vpop.permute.xlu0 %612 }
 0xa94   :  { %v615_v43 = vmul.f32 %v613_v42, %v598_v35  ;;  %v918_v35 = vld [vmem:[#allocation2 + $0x7] ss:$8 sm:$0xf0] }
 0xa95   :  { %v919_v37 = vor.u32 %v918_v35, %v917_v36 }
 0xa96   :  { %621 = vrot.lane.b32.xlu1 %v615_v43, %s1344_s5 }
 0xb08   :  { %v622_v44 = vpop.permute.xlu1 %621 }
 0xb09   :  { %1173 = vmatmul.mubr.msk.f32.vlgmr.msra.gmra.mxu0 %vm221_vm2, %v622_v44 }
 0xb0a   :  { %1187 = vmatpush3.msra.mxu0 %v1384_v6  ;;  %1194 = vmatprep.mubr.msk.f32.mxu0 %vm1342_vm0, %v1341_v0 }
 0xb0b   :  { %1188 = vmatprep.subr.mxu0 %v1341_v0 }
 0xb0c   :  { %1189 = vmatpush3.msra.mxu0 %v1386_v7 }
 0xb0d   :  { %1190 = vmatprep.subr.mxu0 %v1341_v0 }
 0xb0e   :  { %1191 = vmatpush3.msra.mxu0 %v1391_v8 }
 0xb0f   :  { %1192 = vmatprep.subr.mxu0 %v1341_v0 }
 0xb10   :  { %1193 = vmatpush3.msra.mxu0 %v1396_v11 }
 0xbc9   :  { %v691_v48 = vpop.f32.mrf.mxu0 }
 0xbca   :  { %v695_v49 = vadd.f32 %v691_v48, %v619_v47 }
 0xbcb   :  { %v1174_v50 = vpop.f32.mrf.mxu0 }
 0xbcc   :  { %1234 = vtanh.f32 %v695_v49 }
 0xbd9   :  { %v1235_v51 = vpop.eup %1234 }
 0xbda   :  { %701 = vrot.lane.b32.xlu0 %v1235_v51, %s1343_s3  ;;  %v697_v52 = vadd.f32 1.0, %v1235_v51 }
 0xbdc   :  { %v698_v53 = vmul.f32 0.5, %v697_v52 }
 0xbde   :  { %v699_v56 = vmul.f32 %v698_v53, %v609_v40 }
 0xc4c   :  { %v702_v54 = vpop.permute.xlu0 %701 }
 0xc4d   :  { %v704_v55 = vmul.f32 %v702_v54, %v698_v53 }
 0xc4f   :  { %706 = vrot.lane.b32.xlu1 %v704_v55, %s1344_s5 }
 0xcc1   :  { %v707_v57 = vpop.permute.xlu1 %706 }
 0xcc2   :  { %v709_v58 = vadd.f32 %v707_v57, %v699_v56 }
 0xcc4   :  { %1236 = vtanh.f32 %v709_v58 }
 0xcd1   :  { %v1237_v59 = vpop.eup %1236 }
 0xcd2   :  { %712 = vrot.lane.b32.xlu0 %v1237_v59, %s1343_s3 }
 0xd44   :  { %v713_v60 = vpop.permute.xlu0 %712 }
 0xd45   :  { %v715_v61 = vmul.f32 %v713_v60, %v698_v53 }
 0xd47   :  { %721 = vrot.lane.b32.xlu1 %v715_v61, %s1344_s5 }
 0xdb9   :  { %v722_v62 = vpop.permute.xlu1 %721 }
 0xdba   :  { %1184 = vmatmul.mubr.msk.f32.vlgmr.msra.gmra.mxu1 %vm221_vm2, %v722_v62 }
 0xdbb   :  { %1198 = vmatpush3.msra.mxu1 %v1384_v6  ;;  %1205 = vmatprep.mubr.msk.f32.mxu1 %vm1342_vm0, %v1341_v0 }
 0xdbc   :  { %1199 = vmatprep.subr.mxu1 %v1341_v0 }
 0xdbd   :  { %1200 = vmatpush3.msra.mxu1 %v1386_v7 }
 0xdbe   :  { %1201 = vmatprep.subr.mxu1 %v1341_v0 }
 0xdbf   :  { %1202 = vmatpush3.msra.mxu1 %v1391_v8 }
 0xdc0   :  { %1203 = vmatprep.subr.mxu1 %v1341_v0 }
 0xdc1   :  { %1204 = vmatpush3.msra.mxu1 %v1396_v11 }
 0xe7a   :  { %v791_v3 = vpop.f32.mrf.mxu1 }
 0xe7b   :  { %v795_v6 = vadd.f32 %v791_v3, %v719_v2 }
 0xe7c   :  { %v1185_v4 = vpop.f32.mrf.mxu1 }
 0xe7d   :  { %1238 = vtanh.f32 %v795_v6 }
 0xe8a   :  { %v1239_v5 = vpop.eup %1238 }
 0xe8b   :  { %801 = vrot.lane.b32.xlu0 %v1239_v5, %s1343_s3  ;;  %v797_v9 = vadd.f32 1.0, %v1239_v5 }
 0xe8d   :  { %v798_v7 = vmul.f32 0.5, %v797_v9 }
 0xe8f   :  { %v799_v8 = vmul.f32 %v798_v7, %v709_v58 }
 0xefd   :  { %v802_v10 = vpop.permute.xlu0 %801 }
 0xefe   :  { %v804_v12 = vmul.f32 %v802_v10, %v798_v7 }
 0xf00   :  { %806 = vrot.lane.b32.xlu1 %v804_v12, %s1344_s5 }
 0xf72   :  { %v807_v0 = vpop.permute.xlu1 %806 }
 0xf73   :  { %v809_v13 = vadd.f32 %v807_v0, %v799_v8 }
 0xf75   :  { %1240 = vtanh.f32 %v809_v13 }
 0xf82   :  { %v1241_v11 = vpop.eup %1240 }
 0xf83   :  { %812 = vrot.lane.b32.xlu0 %v1241_v11, %s1343_s3 }
 0xff5   :  { %v813_v14 = vpop.permute.xlu0 %812 }
 0xff6   :  { %v815_v15 = vmul.f32 %v813_v14, %v798_v7 }
 0xff8   :  { %821 = vrot.lane.b32.xlu1 %v815_v15, %s1344_s5 }
0x106a   :  { %v822_v16 = vpop.permute.xlu1 %821 }
0x106b   :  { %1195 = vmatmul.mubr.msk.f32.vlgmr.msra.gmra.mxu0 %vm221_vm2, %v822_v16 }
0x112b   :  { %v891_v20 = vpop.f32.mrf.mxu0 }
0x112c   :  { %v895_v21 = vadd.f32 %v891_v20, %v819_v19 }
0x112d   :  { %v1196_v22 = vpop.f32.mrf.mxu0 }
0x112e   :  { %1242 = vtanh.f32 %v895_v21 }
0x113b   :  { %v1243_v23 = vpop.eup %1242 }
0x113c   :  { %901 = vrot.lane.b32.xlu0 %v1243_v23, %s1343_s3  ;;  %v897_v24 = vadd.f32 1.0, %v1243_v23 }
0x113e   :  { %v898_v25 = vmul.f32 0.5, %v897_v24 }
0x1140   :  { %v899_v28 = vmul.f32 %v898_v25, %v809_v13 }
0x11ae   :  { %v902_v26 = vpop.permute.xlu0 %901 }
0x11af   :  { %v904_v27 = vmul.f32 %v902_v26, %v898_v25 }
0x11b1   :  { %906 = vrot.lane.b32.xlu1 %v904_v27, %s1344_s5 }
0x1223   :  { %v907_v29 = vpop.permute.xlu1 %906 }
0x1224   :  { %v909_v30 = vadd.f32 %v907_v29, %v899_v28 }
0x1226   :  { %1244 = vtanh.f32 %v909_v30 }
0x1233   :  { %v1245_v31 = vpop.eup %1244 }
0x1234   :  { %912 = vrot.lane.b32.xlu0 %v1245_v31, %s1343_s3 }
0x12a6   :  { %v913_v32 = vpop.permute.xlu0 %912 }
0x12a7   :  { %v915_v33 = vmul.f32 %v913_v32, %v898_v25 }
0x12a9   :  { %921 = vrot.lane.b32.xlu1 %v915_v33, %s1344_s5 }
0x131b   :  { %v922_v34 = vpop.permute.xlu1 %921 }
0x131c   :  { %1206 = vmatmul.mubr.msk.f32.vlgmr.msra.gmra.mxu1 %vm221_vm2, %v922_v34 }
0x13dc   :  { %v991_v38 = vpop.f32.mrf.mxu1 }
0x13dd   :  { %v995_v39 = vadd.f32 %v991_v38, %v919_v37 }
0x13de   :  { %v1207_v40 = vpop.f32.mrf.mxu1 }
0x13df   :  { %1246 = vtanh.f32 %v995_v39 }
0x13ec   :  { %v1247_v41 = vpop.eup %1246 }
0x13ed   :  { %1001 = vrot.lane.b32.xlu0 %v1247_v41, %s1343_s3  ;;  %v997_v42 = vadd.f32 1.0, %v1247_v41 }
0x13ef   :  { %v998_v43 = vmul.f32 0.5, %v997_v42 }
0x13f1   :  { %v999_v46 = vmul.f32 %v998_v43, %v909_v30 }
0x145f   :  { %v1002_v44 = vpop.permute.xlu0 %1001 }
0x1460   :  { %v1004_v45 = vmul.f32 %v1002_v44, %v998_v43 }
0x1462   :  { %1006 = vrot.lane.b32.xlu1 %v1004_v45, %s1344_s5 }
0x14d4   :  { %v1007_v47 = vpop.permute.xlu1 %1006 }
0x14d5   :  { %v1009_v48 = vadd.f32 %v1007_v47, %v999_v46 }
0x14d7   :  { %1248 = vtanh.f32 %v1009_v48 }
0x14e4   :  { %v1249_v49 = vpop.eup %1248 }
0x14e5   :  { %1012 = vrot.lane.b32.xlu0 %v1249_v49, %s1343_s3 }
0x1557   :  { %v1013_v50 = vpop.permute.xlu0 %1012 }
0x1558   :  { %v1015_v51 = vmul.f32 %v1013_v50, %v998_v43 }
0x155a   :  { %1017 = vrot.lane.b32.xlu1 %v1015_v51, %s1344_s5 }
0x15cc   :  { %v1018_v52 = vpop.permute.xlu1 %1017 }
0x15cd   :  { %1021 = vst.msk [vmem:[#allocation9] sm:$0xff] %vm1020_vm3, %v1018_v52 }
0x15ce   :  { %1321 = shalt.err (!%p1318_p5)
}
0x15cf   :  { %1031 = dma.vmem_to_hbm [thread:$0]  %s1029_s7, 128, %s1526_s4, [#allocation5]  }
0x15d0   :  { %1334 = dma.done.wait [#allocation5], 128  }
0x15d1   :  { %1335 = vsyncadd [#allocation5], 4294967168 }
0x15d2   :  { %1035 = vsyncpa [#allocation4], 1 }
0x15d3   :  { %1036 = vsyncpa [#allocation7], 1 }
0x15d4   :  { %1037 = vsyncpa [#allocation5], 1 }

</bundles_post_ra>
